<compile_context>
chip_gen: v7x
topology: tpu7x:2x2x1
jax: 0.10.0
libtpu: 0.0.40
codegen_flags: <defaults>
</compile_context>

<pallas_src>
import functools
import math

import jax
import jax.numpy as jnp
from jax.experimental import pallas as pl
from jax.experimental.pallas import tpu as pltpu


def _softmax_exp_dtype():
    # bf16 exp uses the bf16-capable EUP on v6e/v7x (~2x rate); keep f32 on v5e and older
    # (no bf16 VPU/EUP there).
    try:
        kind = jax.devices()[0].device_kind.lower()
    except Exception:
        return jnp.float32
    return jnp.bfloat16 if ("v6" in kind or "v7" in kind) else jnp.float32


# ---------------------------------------------------------------------------
# Kernel 1: tiled linear  y = x @ w_t + b   (w_t is the pre-transposed bf16 weight)
# ---------------------------------------------------------------------------
def _linear_kernel(x_ref, wt_ref, b_ref, o_ref):
    # bf16 MXU operands, f32 accumulation, f32 bias add.
    acc = jnp.dot(x_ref[...].astype(jnp.bfloat16), wt_ref[...],
                  preferred_element_type=jnp.float32)
    o_ref[...] = (acc + b_ref[...].astype(jnp.float32)).astype(o_ref.dtype)


def pallas_linear(x, w_t, b, *, out_dtype=None, block_m=512, block_n=2048):
    """x: (M, K), w_t: (K, Nout) bf16, b: (Nout,) f32 -> (M, Nout) out_dtype."""
    M, K = x.shape
    Nout = w_t.shape[1]
    out_dtype = out_dtype if out_dtype is not None else x.dtype
    tm = M if M <= block_m else block_m
    tn = Nout if Nout <= block_n else block_n
    # Nout axis outermost, M axis innermost -> the (K, tn) weight tile stays resident
    # across the inner M sweep (constant block index => no re-DMA).
    grid = (pl.cdiv(Nout, tn), pl.cdiv(M, tm))
    return pl.pallas_call(
        _linear_kernel,
        out_shape=jax.ShapeDtypeStruct((M, Nout), out_dtype),
        grid=grid,
        in_specs=[
            pl.BlockSpec((tm, K), lambda j, i: (i, 0)),
            pl.BlockSpec((K, tn), lambda j, i: (0, j)),
            pl.BlockSpec((1, tn), lambda j, i: (0, j)),
        ],
        out_specs=pl.BlockSpec((tm, tn), lambda j, i: (i, j)),
        compiler_params=pltpu.CompilerParams(
            dimension_semantics=("parallel", "parallel")),
    )(x, w_t, b.reshape(1, Nout))


# ---------------------------------------------------------------------------
# Kernel 2: attention core (all H heads) + fused out-projection
# ---------------------------------------------------------------------------
def _mha_heads(q, k, v, num_heads, exp_dtype):
    """q: (L, E), k/v: (S, E) -> (L, E) f32. bf16 MXU inputs, f32 stats/accumulation."""
    # TODO(synk): flash-style online-softmax S-tiling for very long sequences.
    L, E = q.shape
    S = k.shape[0]
    d = E // num_heads
    qh = q.reshape(L, num_heads, d).astype(jnp.bfloat16)
    kh = k.reshape(S, num_heads, d).astype(jnp.bfloat16)
    vh = v.reshape(S, num_heads, d).astype(jnp.bfloat16)
    s = jnp.einsum("lhd,shd->hls", qh, kh, preferred_element_type=jnp.float32)
    m = jnp.max(s, axis=-1, keepdims=True)                       # (H, L, 1) f32
    p = jnp.exp((s - m).astype(exp_dtype))                       # (H, L, S)
    denom = jnp.sum(p.astype(jnp.float32), axis=-1)              # (H, L)  f32
    o = jnp.einsum("hls,shd->lhd", p.astype(jnp.bfloat16), vh,
                   preferred_element_type=jnp.float32)           # (L, H, d) f32
    # normalize AFTER the PV matmul: scales (L,H,d), not the (H,L,S) score tile
    inv = pl.reciprocal(denom, approx=True)                      # (H, L)
    o = o * inv.T[:, :, None]                                    # (L, H, 1) broadcast
    return o.reshape(L, E)


def _attn_outproj_kernel_packed(q_ref, k_ref, v_ref, wo_ref, bo_ref, o_ref, *,
                                num_heads, exp_dtype):
    # q: (tl, E), k/v: (S, E) column blocks of a lane-packed slab; wo: (E, E) bf16.
    o = _mha_heads(q_ref[...], k_ref[...], v_ref[...], num_heads, exp_dtype)
    o_ref[...] = (
        jnp.dot(o.astype(jnp.bfloat16), wo_ref[...], preferred_element_type=jnp.float32)
        + bo_ref[...]
    ).astype(o_ref.dtype)


def _attn_outproj_kernel_batched(q_ref, k_ref, v_ref, wo_ref, bo_ref, o_ref, *,
                                 num_heads, exp_dtype):
    # q: (1, L, E), k/v: (1, S, E) batch-major blocks (fallback path).
    o = _mha_heads(q_ref[0], k_ref[0], v_ref[0], num_heads, exp_dtype)
    o_ref[0] = (
        jnp.dot(o.astype(jnp.bfloat16), wo_ref[...], preferred_element_type=jnp.float32)
        + bo_ref[...]
    ).astype(o_ref.dtype)


def _choose_row_tile(L, max_tile=256):
    if L <= max_tile:
        return L
    for t in (256, 128, 64, 32, 16, 8):
        if L % t == 0:
            return t
    return L


def _attention_outproj_packed(q_arr, k_arr, v_arr, wo_t, bo, *, L, S, N, E,
                              num_heads, q_col, k_col, v_col, exp_dtype):
    tl = _choose_row_tile(L)
    kernel = functools.partial(_attn_outproj_kernel_packed,
                               num_heads=num_heads, exp_dtype=exp_dtype)
    return pl.pallas_call(
        kernel,
        out_shape=jax.ShapeDtypeStruct((L, N * E), jnp.float32),
        grid=(N, L // tl),                    # row-tile axis innermost: k/v/wo stay resident
        in_specs=[
            pl.BlockSpec((tl, E), lambda b, l: (l, q_col(b))),
            pl.BlockSpec((S, E), lambda b, l: (0, k_col(b))),
            pl.BlockSpec((S, E), lambda b, l: (0, v_col(b))),
            pl.BlockSpec((E, E), lambda b, l: (0, 0)),
            pl.BlockSpec((1, E), lambda b, l: (0, 0)),
        ],
        out_specs=pl.BlockSpec((tl, E), lambda b, l: (l, b)),
        compiler_params=pltpu.CompilerParams(
            dimension_semantics=("parallel", "parallel")),
    )(q_arr, k_arr, v_arr, wo_t, bo.reshape(1, E))


# ---------------------------------------------------------------------------
# Full MultiheadAttention forward (dropout_rate=0.0 -> identity)
# ---------------------------------------------------------------------------
def multihead_attention(query, key, value, params, num_heads):
    # query: (L, N, E), key/value: (S, N, E)  (torch batch_first=False layout)
    L, N, E = query.shape
    S = key.shape[0]
    H = num_heads
    d = E // H
    scale = 1.0 / math.sqrt(d)

    in_w = params["in_proj_weight"].astype(jnp.float32)    # (3E, E)
    in_b = params["in_proj_bias"].astype(jnp.float32)      # (3E,)
    out_w = params["out_proj_weight"].astype(jnp.float32)  # (E, E)
    out_b = params["out_proj_bias"].astype(jnp.float32)    # (E,)

    # fold 1/sqrt(d) into wq/bq; pre-transpose once; bf16 weights (MXU-native rhs, half VMEM/HBM)
    w_packed_t = jnp.concatenate([in_w[:E] * scale, in_w[E:]], axis=0).T.astype(jnp.bfloat16)  # (E,3E)
    b_packed = jnp.concatenate([in_b[:E] * scale, in_b[E:]], axis=0)                           # (3E,) f32
    out_w_t = out_w.T.astype(jnp.bfloat16)                                                     # (E, E)

    exp_dtype = _softmax_exp_dtype()

    if E % 128 == 0:
        # ---- lane-dense path (covers ViT): per-batch q/k/v are E-wide column blocks,
        #      selected purely via BlockSpec index maps -> zero HBM transposes ----
        if (query is key) and (key is value):
            # fused QKV projection -> packed (L, N*3E) bf16 slab; batch b columns: [q|k|v]
            qkv = pallas_linear(query.reshape(L * N, E), w_packed_t, b_packed,
                                out_dtype=jnp.bfloat16)
            slab = qkv.reshape(L, N * 3 * E)
            q_arr = k_arr = v_arr = slab
            q_col = lambda b: 3 * b
            k_col = lambda b: 3 * b + 1
            v_col = lambda b: 3 * b + 2
        else:
            wq_t = w_packed_t[:, :E]
            wk_t = w_packed_t[:, E:2 * E]
            wv_t = w_packed_t[:, 2 * E:]
            bq, bk, bv = b_packed[:E], b_packed[E:2 * E], b_packed[2 * E:]
            q_arr = pallas_linear(query.reshape(L * N, E), wq_t, bq,
                                  out_dtype=jnp.bfloat16).reshape(L, N * E)
            k_arr = pallas_linear(key.reshape(S * N, E), wk_t, bk,
                                  out_dtype=jnp.bfloat16).reshape(S, N * E)
            v_arr = pallas_linear(value.reshape(S * N, E), wv_t, bv,
                                  out_dtype=jnp.bfloat16).reshape(S, N * E)
            q_col = k_col = v_col = lambda b: b

        out = _attention_outproj_packed(
            q_arr, k_arr, v_arr, out_w_t, out_b, L=L, S=S, N=N, E=E, num_heads=H,
            q_col=q_col, k_col=k_col, v_col=v_col, exp_dtype=exp_dtype)
        return out.reshape(L, N, E)   # already torch (L, N, E) layout

    # ---- fallback path (E not a multiple of 128): batch-major blocks ----
    # TODO(synk): express per-batch selection via BlockSpec index maps for
    #             non-lane-aligned E to drop these HBM transposes.
    wq_t = w_packed_t[:, :E]
    wk_t = w_packed_t[:, E:2 * E]
    wv_t = w_packed_t[:, 2 * E:]
    bq, bk, bv = b_packed[:E], b_packed[E:2 * E], b_packed[2 * E:]
    qx = jnp.transpose(query, (1, 0, 2)).reshape(N * L, E)
    kx = jnp.transpose(key, (1, 0, 2)).reshape(N * S, E)
    vx = jnp.transpose(value, (1, 0, 2)).reshape(N * S, E)
    q = pallas_linear(qx, wq_t, bq, out_dtype=jnp.bfloat16).reshape(N, L, E)
    k = pallas_linear(kx, wk_t, bk, out_dtype=jnp.bfloat16).reshape(N, S, E)
    v = pallas_linear(vx, wv_t, bv, out_dtype=jnp.bfloat16).reshape(N, S, E)
    attn = pl.pallas_call(
        functools.partial(_attn_outproj_kernel_batched, num_heads=H, exp_dtype=exp_dtype),
        out_shape=jax.ShapeDtypeStruct((N, L, E), jnp.float32),
        grid=(N,),
        in_specs=[
            pl.BlockSpec((1, L, E), lambda b: (b, 0, 0)),
            pl.BlockSpec((1, S, E), lambda b: (b, 0, 0)),
            pl.BlockSpec((1, S, E), lambda b: (b, 0, 0)),
            pl.BlockSpec((E, E), lambda b: (0, 0)),
            pl.BlockSpec((1, E), lambda b: (0, 0)),
        ],
        out_specs=pl.BlockSpec((1, L, E), lambda b: (b, 0, 0)),
        compiler_params=pltpu.CompilerParams(dimension_semantics=("parallel",)),
    )(q, k, v, out_w_t, out_b.reshape(1, E))
    return jnp.transpose(attn, (1, 0, 2))


# ---------------------------------------------------------------------------
# Pure-JAX (f32) reference for a sanity check (torch semantics)
# ---------------------------------------------------------------------------
def reference_mha(query, key, value, params, num_heads):
    L, N, E = query.shape
    S = key.shape[0]
    H = num_heads
    d = E // H
    in_w, in_b = params["in_proj_weight"], params["in_proj_bias"]
    out_w, out_b = params["out_proj_weight"], params["out_proj_bias"]
    wq, wk, wv = in_w[:E], in_w[E:2 * E], in_w[2 * E:]
    bq, bk, bv = in_b[:E], in_b[E:2 * E], in_b[2 * E:]
    q = query.reshape(L * N, E) @ wq.T + bq
    k = key.reshape(S * N, E) @ wk.T + bk
    v = value.reshape(S * N, E) @ wv.T + bv
    q = q * (1.0 / math.sqrt(d))
    q = q.reshape(L, N * H, d).transpose(1, 0, 2)
    k = k.reshape(S, N * H, d).transpose(1, 0, 2)
    v = v.reshape(S, N * H, d).transpose(1, 0, 2)
    s = jnp.einsum("bld,bsd->bls", q, k)
    p = jax.nn.softmax(s, axis=-1)
    o = jnp.einsum("bls,bsd->bld", p, v)
    o = o.transpose(1, 0, 2).reshape(L * N, E)
    return (o @ out_w.T + out_b).reshape(L, N, E)


if __name__ == "__main__":
    # Small shapes. E=128 (multiple of 128) so the lane-dense fused path is exercised;
    # H=4 heads (d=32), L=8, S=16, batch N=2.
    E, H, L, S, N = 128, 4, 8, 16, 2

    key0 = jax.random.PRNGKey(0)
    ks = jax.random.split(key0, 8)

    params = {
        "in_proj_weight": jax.random.normal(ks[0], (3 * E, E), jnp.float32) * 0.1,
        "in_proj_bias": jax.random.normal(ks[1], (3 * E,), jnp.float32) * 0.1,
        "out_proj_weight": jax.random.normal(ks[2], (E, E), jnp.float32) * 0.1,
        "out_proj_bias": jax.random.normal(ks[3], (E,), jnp.float32) * 0.1,
    }

    # (1) Self-attention (the ViT use case): query is key is value -> fused QKV path.
    x = jax.random.normal(ks[4], (L, N, E), jnp.float32)
    out_self = jax.block_until_ready(multihead_attention(x, x, x, params, num_heads=H))
    ref_self = reference_mha(x, x, x, params, num_heads=H)
    assert out_self.shape == (L, N, E)
    # bf16 MXU inputs throughout (f32 accumulation) -> relaxed tolerance vs f32 reference.
    assert jnp.allclose(out_self, ref_self, atol=3e-2, rtol=3e-2), "self-attn mismatch"

    # (2) Cross-attention: distinct q/k/v, S != L (still the lane-dense packed path).
    q_in = jax.random.normal(ks[5], (L, N, E), jnp.float32)
    k_in = jax.random.normal(ks[6], (S, N, E), jnp.float32)
    v_in = jax.random.normal(ks[7], (S, N, E), jnp.float32)
    out_cross = jax.block_until_ready(
        multihead_attention(q_in, k_in, v_in, params, num_heads=H))
    ref_cross = reference_mha(q_in, k_in, v_in, params, num_heads=H)
    assert out_cross.shape == (L, N, E)
    assert jnp.allclose(out_cross, ref_cross, atol=3e-2, rtol=3e-2), "cross-attn mismatch"

    print("KERNEL_OK")
</pallas_src>

<mosaic_0001>
module attributes {stable_mosaic.version = 11 : i64} {
  func.func @_linear_kernel(%arg0: i32, %arg1: i32, %arg2: memref<16x128xf32, #tpu.memory_space<vmem>>, %arg3: memref<128x384xbf16, #tpu.memory_space<vmem>>, %arg4: memref<1x384xf32, #tpu.memory_space<vmem>>, %arg5: memref<16x384xbf16, #tpu.memory_space<vmem>>) attributes {dimension_semantics = [#tpu.dimension_semantics<parallel>, #tpu.dimension_semantics<parallel>], iteration_bounds = array<i64: 1, 1>, scalar_prefetch = 0 : i64, scratch_operands = 0 : i64, tpu.core_type = #tpu.core_type<tc>, window_params = [{transform_indices = @transform_0, window_bounds = array<i64: 16, 128>}, {transform_indices = @transform_1, window_bounds = array<i64: 128, 384>}, {transform_indices = @transform_2, window_bounds = array<i64: 1, 384>}, {transform_indices = @transform_3, window_bounds = array<i64: 16, 384>}]} {
    %c0 = arith.constant 0 : index
    %c0_0 = arith.constant 0 : index
    %0 = vector.load %arg2[%c0, %c0_0] : memref<16x128xf32, #tpu.memory_space<vmem>>, vector<16x128xf32>
    %1 = arith.truncf %0 : vector<16x128xf32> to vector<16x128xbf16>
    %c0_1 = arith.constant 0 : index
    %c0_2 = arith.constant 0 : index
    %2 = vector.load %arg3[%c0_1, %c0_2] : memref<128x384xbf16, #tpu.memory_space<vmem>>, vector<128x384xbf16>
    %cst = arith.constant dense<0.000000e+00> : vector<16x384xf32>
    %3 = tpu.matmul %1, %2, %cst {dimension_numbers = #tpu.dot_dimension_numbers<[1], [0], [0], [1], [0, 0, 1, 1], [], []>} : vector<16x128xbf16>, vector<128x384xbf16>, vector<16x384xf32> -> vector<16x384xf32>
    %c0_3 = arith.constant 0 : index
    %c0_4 = arith.constant 0 : index
    %4 = vector.load %arg4[%c0_3, %c0_4] : memref<1x384xf32, #tpu.memory_space<vmem>>, vector<1x384xf32>
    %5 = vector.broadcast %4 : vector<1x384xf32> to vector<16x384xf32>
    %6 = arith.addf %3, %5 : vector<16x384xf32>
    %7 = arith.truncf %6 : vector<16x384xf32> to vector<16x384xbf16>
    %c0_5 = arith.constant 0 : index
    %c0_6 = arith.constant 0 : index
    %8 = vector.load %arg5[%c0_5, %c0_6] : memref<16x384xbf16, #tpu.memory_space<vmem>>, vector<16x384xbf16>
    tpu.vector_store %arg5[%c0_5, %c0_6], %7 {strides = array<i32>} : memref<16x384xbf16, #tpu.memory_space<vmem>>, vector<16x384xbf16>,
    return
  }
  func.func @transform_0(%arg0: i32, %arg1: i32) -> (i32, i32) {
    %c0_i32 = arith.constant 0 : i32
    %c0_i32_0 = arith.constant 0 : i32
    return %arg1, %c0_i32 : i32, i32
  }
  func.func @transform_1(%arg0: i32, %arg1: i32) -> (i32, i32) {
    %c0_i32 = arith.constant 0 : i32
    %c0_i32_0 = arith.constant 0 : i32
    return %c0_i32, %arg0 : i32, i32
  }
  func.func @transform_2(%arg0: i32, %arg1: i32) -> (i32, i32) {
    %c0_i32 = arith.constant 0 : i32
    %c0_i32_0 = arith.constant 0 : i32
    return %c0_i32, %arg0 : i32, i32
  }
  func.func @transform_3(%arg0: i32, %arg1: i32) -> (i32, i32) {
    %c0_i32 = arith.constant 0 : i32
    return %arg1, %arg0 : i32, i32
  }
}

</mosaic_0001>

<bundles_post_ra>
// kernel: tpu_custom_call.1
= control target key start
LH: loop header
LB: loop body
LE: loop exit
PB: predicated region body
PF: predicated region fallthrough
CT: control target
= control target key end

     0   :  { %8 = vsyncpa [#allocation3], 0  ;;  %s600_s0 = inlined_call_operand.hbm [shape: f32[16,128], index: 0, kind: input, shape index: {}]   ;;  %s601_s1 = inlined_call_operand.hbm [shape: bf16[128,384], index: 1, kind: input, shape index: {}]   ;;  %s602_s2 = inlined_call_operand.vmem [shape: f32[1,384], index: 2, kind: input, shape index: {}]   ;;  %s603_s3 = inlined_call_operand.hbm [shape: bf16[16,384], index: 3, kind: output, shape index: {}]  }
   0x1   :  { %9 = vsyncpa [#allocation6], 0 }
   0x2   :  { %10 = vsyncpa [#allocation4], 0  ;;  %s525_s12 = smov [#allocation2]   ;;  %s453_s16 = scalar_lea.hbm %s600_s0, 256 }
   0x3   :  { %s16_s13 = sshll.u32 %s525_s12, 4  ;;  %p454_p0 = scmp.ne.s32.totalorder %s600_s0, %s453_s16  ;;  %s17_s13 = int_to_ptr.vmem [resolvable:$true] %s16_s13 }
   0x4   :  { %p457_p1 = scmp.lt.u32.totalorder %s453_s16, %s600_s0 }
   0x6   :  { %p459_p2 = pnand %p457_p1, %p454_p0 }
   0x8   :  { %462 = shalt.err (!%p459_p2)
}
   0x9   :  { %s463_s21 = scalar_lea.vmem %s17_s13, 256  ;;  %p468_p4 = scmp.lt.s32.totalorder %s17_s13, %s17_s13 }
   0xa   :  { %p464_p3 = scmp.ne.s32.totalorder %s17_s13, %s463_s21  ;;  %p469_p5 = scmp.lt.s32.totalorder %s463_s21, %s463_s21 }
   0xc   :  { %p470_p6 = por %p469_p5, %p468_p4 }
   0xe   :  { %p471_p7 = pnand %p470_p6, %p464_p3 }
  0x10   :  { %474 = shalt.err (!%p471_p7)
}
  0x11   :  { %s526_s22 = smov 128   ;;  %s527_s23 = smov 8  }
  0x12   :  { %22 = dma.hbm_to_vmem [thread:$0]  %s600_s0, 256, %s17_s13, [#allocation3], %s526_s22, %s526_s22, %s527_s23  }
  0x13   :  { %s528_s26 = smov [#allocation5]   ;;  %s475_s30 = scalar_lea.hbm %s601_s1, 3072 }
  0x14   :  { %s28_s27 = sshll.u32 %s528_s26, 4  ;;  %p476_p8 = scmp.ne.s32.totalorder %s601_s1, %s475_s30  ;;  %s29_s27 = int_to_ptr.vmem [resolvable:$true] %s28_s27 }
  0x15   :  { %p479_p9 = scmp.lt.u32.totalorder %s475_s30, %s601_s1 }
  0x17   :  { %p481_p10 = pnand %p479_p9, %p476_p8 }
  0x19   :  { %484 = shalt.err (!%p481_p10)
}
  0x1a   :  { %s485_s8 = scalar_lea.vmem %s29_s27, 3072  ;;  %p490_p12 = scmp.lt.s32.totalorder %s29_s27, %s29_s27 }
  0x1b   :  { %p486_p11 = scmp.ne.s32.totalorder %s29_s27, %s485_s8  ;;  %p491_p13 = scmp.lt.s32.totalorder %s485_s8, %s485_s8 }
  0x1d   :  { %p492_p0 = por %p491_p13, %p490_p12 }
  0x1f   :  { %p493_p1 = pnand %p492_p0, %p486_p11 }
  0x21   :  { %496 = shalt.err (!%p493_p1)
}
  0x22   :  { %s529_s0 = smov 192   ;;  %s530_s9 = smov 12  }
  0x23   :  { %34 = dma.hbm_to_vmem [thread:$0]  %s601_s1, 3072, %s29_s27, [#allocation6], %s529_s0, %s529_s0, %s530_s9  }
  0x24   :  { %519 = dma.done.wait [#allocation3], 256  }
  0x25   :  { %520 = vsyncadd [#allocation3], 4294967040 }
  0x26   :  { %521 = dma.done.wait [#allocation6], 3072  }
  0x27   :  { %522 = vsyncadd [#allocation6], 4294964224  ;;  %v531_v0 = vmov 0.0   ;;  %vm532_vm0 = vmmov 0   ;;  %v533_v1 = vmov 0   ;;  %v44_v25 = vld [vmem:[#allocation2] sm:$0xff]  ;;  %v81_v29 = vlaneseq }
  0x28   :  { %391 = vmatprep.subr.bf16.mxu1 %v531_v0  ;;  %407 = vmatprep.mubr.msk.bf16.mxu1 %vm532_vm0, %v531_v0  ;;  %v421_v2 = vld [vmem:[#allocation5 + $0x4] ss:$12 sps:$4 sm:$0xff]   ;;  %v423_v3 = vld [vmem:[#allocation5 + $0x8] ss:$12 sps:$4 sm:$0xff]   ;;  %v424_v4 = vld [vmem:[#allocation5] ss:$12 sps:$4 sm:$0xff]  }
  0x29   :  { %256 = vmatprep.mubr.bf16.mxu0 %v533_v1  ;;  %224 = vmatprep.subr.bf16.mxu0 %v421_v2  ;;  %v425_v5 = vld [vmem:[#allocation5 + $0x1c] ss:$12 sps:$4 sm:$0xff]   ;;  %v427_v6 = vld [vmem:[#allocation5 + $0x20] ss:$12 sps:$4 sm:$0xff]   ;;  %v428_v7 = vld [vmem:[#allocation5 + $0x18] ss:$12 sps:$4 sm:$0xff]  }
  0x2a   :  { %392 = vmatpush3.bf16.msra.mxu1 %v423_v3  ;;  %225 = vmatpush1.bf16.msra.mxu0 %v424_v4  ;;  %v429_v8 = vld [vmem:[#allocation5 + $0x34] ss:$12 sps:$4 sm:$0xff]   ;;  %v431_v9 = vld [vmem:[#allocation5 + $0x38] ss:$12 sps:$4 sm:$0xff]   ;;  %v432_v10 = vld [vmem:[#allocation5 + $0x30] ss:$12 sps:$4 sm:$0xff]  }
  0x2b   :  { %393 = vmatprep.subr.bf16.mxu1 %v531_v0  ;;  %226 = vmatprep.subr.bf16.mxu0 %v425_v5  ;;  %v433_v11 = vld [vmem:[#allocation5 + $0x4c] ss:$12 sps:$4 sm:$0xff]   ;;  %v435_v12 = vld [vmem:[#allocation5 + $0x50] ss:$12 sps:$4 sm:$0xff]   ;;  %v436_v13 = vld [vmem:[#allocation5 + $0x48] ss:$12 sps:$4 sm:$0xff]  }
  0x2c   :  { %v437_v14 = vld [vmem:[#allocation5 + $0x64] ss:$12 sps:$4 sm:$0xff]   ;;  %v439_v15 = vld [vmem:[#allocation5 + $0x68] ss:$12 sps:$4 sm:$0xff]   ;;  %v440_v16 = vld [vmem:[#allocation5 + $0x60] ss:$12 sps:$4 sm:$0xff]  }
  0x2d   :  { %v441_v17 = vld [vmem:[#allocation5 + $0x7c] ss:$12 sps:$4 sm:$0xff]   ;;  %v443_v18 = vld [vmem:[#allocation5 + $0x80] ss:$12 sps:$4 sm:$0xff]   ;;  %v444_v19 = vld [vmem:[#allocation5 + $0x78] ss:$12 sps:$4 sm:$0xff]  }
  0x2e   :  { %394 = vmatpush3.bf16.msra.mxu1 %v427_v6  ;;  %227 = vmatpush1.bf16.msra.mxu0 %v428_v7  ;;  %v445_v20 = vld [vmem:[#allocation5 + $0x94] ss:$12 sps:$4 sm:$0xff]   ;;  %v447_v21 = vld [vmem:[#allocation5 + $0x98] ss:$12 sps:$4 sm:$0xff]   ;;  %v448_v22 = vld [vmem:[#allocation5 + $0x90] ss:$12 sps:$4 sm:$0xff]  }
  0x2f   :  { %395 = vmatprep.subr.bf16.mxu1 %v531_v0  ;;  %228 = vmatprep.subr.bf16.mxu0 %v429_v8  ;;  %v449_v23 = vld [vmem:[#allocation5 + $0xac] ss:$12 sps:$4 sm:$0xff]   ;;  %v451_v24 = vld [vmem:[#allocation5 + $0xb0] ss:$12 sps:$4 sm:$0xff]   ;;  %v452_v27 = vld [vmem:[#allocation5 + $0xa8] ss:$12 sps:$4 sm:$0xff]  }
  0x30   :  { %v45_v26 = vld [vmem:[#allocation2 + $0x8] sm:$0xff]  ;;  %v82_v30 = vshrl.u32 %v81_v29, 7  ;;  %v79_v32 = vld [vmem:[%s602_s2] sm:$0x7]  ;;  %s534_s2 = smov [#allocation7]  }
  0x31   :  { %v46_v28 = vpack.c.bf16 %v45_v26, %v44_v25  ;;  %s337_s13 = sshll.u32 %s534_s2, 4  ;;  %s338_s13 = int_to_ptr.vmem [resolvable:$true] %s337_s13 }
  0x32   :  { %396 = vmatpush3.bf16.msra.mxu1 %v431_v9  ;;  %229 = vmatpush1.bf16.msra.mxu0 %v432_v10  ;;  %v91_v31 = vsub.s32 2, %v82_v30  ;;  %v83_v33 = vsub.s32 0, %v82_v30  ;;  %v87_v34 = vsub.s32 1, %v82_v30  ;;  %s497_s14 = scalar_lea.vmem %s338_s13, 384  ;;  %p502_p3 = scmp.lt.s32.totalorder %s338_s13, %s338_s13 }
  0x33   :  { %397 = vmatprep.subr.bf16.mxu1 %v531_v0  ;;  %230 = vmatprep.subr.bf16.mxu0 %v433_v11  ;;  %p498_p2 = scmp.ne.s32.totalorder %s338_s13, %s497_s14  ;;  %p503_p4 = scmp.lt.s32.totalorder %s497_s14, %s497_s14 }
  0x34   :  { %v92_v35 = vrot.slane %v79_v32, %v91_v31  ;;  %v84_v36 = vrot.slane %v79_v32, %v83_v33  ;;  %v88_v37 = vrot.slane %v79_v32, %v87_v34 }
  0x35   :  { %p504_p5 = por %p503_p4, %p502_p3 }
  0x36   :  { %398 = vmatpush3.bf16.msra.mxu1 %v435_v12  ;;  %231 = vmatpush1.bf16.msra.mxu0 %v436_v13 }
  0x37   :  { %399 = vmatprep.subr.bf16.mxu1 %v531_v0  ;;  %232 = vmatprep.subr.bf16.mxu0 %v437_v14  ;;  %p505_p6 = pnand %p504_p5, %p498_p2 }
  0x3a   :  { %400 = vmatpush3.bf16.msra.mxu1 %v439_v15  ;;  %233 = vmatpush1.bf16.msra.mxu0 %v440_v16 }
  0x3b   :  { %401 = vmatprep.subr.bf16.mxu1 %v531_v0  ;;  %234 = vmatprep.subr.bf16.mxu0 %v441_v17 }
  0x3e   :  { %402 = vmatpush3.bf16.msra.mxu1 %v443_v18  ;;  %235 = vmatpush1.bf16.msra.mxu0 %v444_v19 }
  0x3f   :  { %403 = vmatprep.subr.bf16.mxu1 %v531_v0  ;;  %236 = vmatprep.subr.bf16.mxu0 %v445_v20 }
  0x42   :  { %404 = vmatpush3.bf16.msra.mxu1 %v447_v21  ;;  %237 = vmatpush1.bf16.msra.mxu0 %v448_v22 }
  0x43   :  { %405 = vmatprep.subr.bf16.mxu1 %v531_v0  ;;  %238 = vmatprep.subr.bf16.mxu0 %v449_v23 }
  0x46   :  { %406 = vmatpush3.bf16.msra.mxu1 %v451_v24  ;;  %239 = vmatpush1.bf16.msra.mxu0 %v452_v27 }
  0x49   :  { %408 = vmatmul.mubr.bf16.vlgmr.msra.gmra.mrb[0].mxu1 %v46_v28  ;;  %257 = vmatmul.mubr.bf16.vlgmr.msra.gmra.mrb[0].mxu0 %v46_v28 }
 0x11c   :  { %v301_v38 = vpop.f32.mrb[0].mxu1  ;;  %v258_v40 = vpop.f32.mrb[0].mxu0 }
 0x11d   :  { %v302_v39 = vadd.f32 %v301_v38, %v92_v35  ;;  %v409_v41 = vpop.f32.mrb[1].mxu1  ;;  %v259_v42 = vadd.f32 %v258_v40, %v84_v36  ;;  %v260_v43 = vpop.f32.mrb[1].mxu0 }
 0x11e   :  { %v304_v44 = vpop.f32.mrb[2].mxu1  ;;  %v261_v46 = vadd.f32 %v260_v43, %v88_v37  ;;  %v262_v48 = vpop.f32.mrb[2].mxu0 }
 0x11f   :  { %v379_v45 = vpack.c.bf16 %v302_v39, %v302_v39  ;;  %v305_v47 = vadd.f32 %v304_v44, %v92_v35  ;;  %v410_v49 = vpop.f32.mrb[3].mxu1  ;;  %v263_v50 = vadd.f32 %v262_v48, %v84_v36  ;;  %v264_v51 = vpop.f32.mrb[3].mxu0 }
 0x120   :  { %v378_v52 = vpack.c.bf16 %v261_v46, %v259_v42  ;;  %v265_v54 = vadd.f32 %v264_v51, %v88_v37 }
 0x121   :  { %329 = vst [vmem:[#allocation7 + $0x8] sm:$0xf] %v379_v45  ;;  %v381_v53 = vpack.c.bf16 %v305_v47, %v305_v47 }
 0x122   :  { %328 = vst [vmem:[#allocation7] sm:$0xff] %v378_v52  ;;  %v380_v55 = vpack.c.bf16 %v265_v54, %v263_v50 }
 0x123   :  { %331 = vst [vmem:[#allocation7 + $0x14] sm:$0xf] %v381_v53 }
 0x124   :  { %330 = vst [vmem:[#allocation7 + $0xc] sm:$0xff] %v380_v55 }
 0x125   :  { %508 = shalt.err (!%p505_p6)
}
 0x126   :  { %s509_s17 = scalar_lea.hbm %s603_s3, 384 }
 0x127   :  { %p510_p7 = scmp.ne.s32.totalorder %s603_s3, %s509_s17  ;;  %p513_p8 = scmp.lt.u32.totalorder %s509_s17, %s603_s3 }
 0x129   :  { %p515_p9 = pnand %p513_p8, %p510_p7 }
 0x12b   :  { %518 = shalt.err (!%p515_p9)
}
 0x12c   :  { %343 = dma.vmem_to_hbm [thread:$0]  %s338_s13, 384, %s603_s3, [#allocation4], %s529_s0, %s529_s0, %s530_s9  }
 0x12d   :  { %523 = dma.done.wait [#allocation4], 384  }
 0x12e   :  { %524 = vsyncadd [#allocation4], 4294966912 }
 0x12f   :  { %347 = vsyncpa [#allocation3], 1 }
 0x130   :  { %348 = vsyncpa [#allocation6], 1 }
 0x131   :  { %349 = vsyncpa [#allocation4], 1 }

</bundles_post_ra>
